<compile_context>
chip_gen: v7x
topology: tpu7x:2x2x1
jax: 0.10.0
libtpu: 0.0.40
codegen_flags: <defaults>
</compile_context>

<pallas_src>
import math
from functools import partial as fpartial

import jax
import jax.numpy as jnp
from jax.experimental import pallas as pl
from jax.experimental.pallas import tpu as pltpu


def _round_up(x, m):
    return ((x + m - 1) // m) * m


def _pick_group_size(n_cond, num_classes, max_lanes=512):
    """Largest divisor of n_cond with G*num_classes <= max_lanes (lane-dense N)."""
    g = 1
    for cand in range(1, n_cond + 1):
        if n_cond % cand == 0 and cand * num_classes <= max_lanes:
            g = cand
    return g


def multi_ce_kernel(x_ref, w_ref, b_ref, lbl_ref, out_ref, *,
                    num_classes, batch_size, block_rows):
    # x arrives f32; cast to bf16 on the VPU right before the MXU (no separate
    # wrapper-side cast pass over HBM).
    x = x_ref[...].astype(jnp.bfloat16)      # [tm, D]
    w = w_ref[0]                              # [D, G*Cp]  bf16 (folded heads)
    b = b_ref[0]                              # [1, G*Cp]  f32
    labels = lbl_ref[0]                       # [tm, G]    int32

    tm = x.shape[0]
    GCp = w.shape[1]
    G = labels.shape[1]
    Cp = GCp // G

    # One lane-dense MXU matmul for all G conditions of this group, f32 accumulate.
    logits = jnp.dot(x, w, preferred_element_type=jnp.float32) + b     # [tm, G*Cp]
    lg = logits.reshape(tm, G, Cp)            # per-condition view (see header TODO)

    # Mask padded classes to a huge negative before the softmax/LSE.
    cls = jax.lax.broadcasted_iota(jnp.int32, (tm, G, Cp), 2)
    lg_m = jnp.where(cls < num_classes, lg, jnp.float32(-1e30))

    # Numerically-stable per-condition log-sum-exp.
    m = jnp.max(lg_m, axis=-1, keepdims=True)                           # [tm, G, 1]
    lse = jnp.log(jnp.sum(jnp.exp(lg_m - m), axis=-1, keepdims=True)) + m

    # Label logit via iota-compare (labels are always < num_classes).
    picked = jnp.sum(jnp.where(cls == labels[..., None], lg, 0.0),
                     axis=-1, keepdims=True)                            # [tm, G, 1]

    ce = (lse - picked)[..., 0]                                         # [tm, G]

    # Mask padded batch rows (global row index >= true batch size).
    row = (jax.lax.broadcasted_iota(jnp.int32, (tm, G), 0)
           + pl.program_id(0) * block_rows)
    ce = jnp.where(row < batch_size, ce, 0.0)

    # Per-tile per-condition partial sums, packed along lanes.
    out_ref[0, 0] = jnp.sum(ce, axis=0, keepdims=True)                  # [1, G]


def fold_heads(head_w, head_b, max_lanes=512):
    """One-time fold of the per-condition linear heads into MXU-friendly blocks.

    Hoisted out of the per-step path (weights are static across steps):
      - bf16 cast,
      - pad class dim C -> Cp so G*Cp is a multiple of 128,
      - fold G conditions into the matmul N dimension.
    """
    n_cond, D, C = head_w.shape
    G = _pick_group_size(n_cond, C, max_lanes)
    n_groups = n_cond // G

    d = 128 // math.gcd(G, 128)
    Cp = _round_up(C, d)                      # G*Cp % 128 == 0

    w = jnp.pad(head_w.astype(jnp.bfloat16), ((0, 0), (0, 0), (0, Cp - C)))
    b = jnp.pad(head_b.astype(jnp.float32), ((0, 0), (0, Cp - C)))

    # Column order inside a group: gi*Cp + c.
    w_g = (w.reshape(n_groups, G, D, Cp)
            .transpose(0, 2, 1, 3)
            .reshape(n_groups, D, G * Cp))
    b_g = b.reshape(n_groups, 1, G * Cp)

    meta = dict(n_cond=n_cond, D=D, C=C, Cp=Cp, G=G, n_groups=n_groups)
    return w_g, b_g, meta


def multi_ce_weighted(images, labels, w_g, b_g, cond_weights, meta,
                      block_rows=None):
    """sum_i( CE_mean(head_i(x), labels_i) * exp(-w_i) + w_i )."""
    n_cond, D, C, Cp, G, n_groups = (meta["n_cond"], meta["D"], meta["C"],
                                     meta["Cp"], meta["G"], meta["n_groups"])
    GCp = G * Cp

    B = images.shape[0]
    # Keep x in f32; the bf16 cast happens inside the kernel.
    x = images.reshape(B, -1).astype(jnp.float32)                       # [B, D]
    assert x.shape[1] == D

    # Batch tiling (both grid axes are "parallel"); v5e prefers 128, v6e/v7x 256.
    if block_rows is None:
        block_rows = min(_round_up(B, 8), 256)
    B_pad = _round_up(B, block_rows)
    if B_pad != B:
        x = jnp.pad(x, ((0, B_pad - B), (0, 0)))
    n_btiles = B_pad // block_rows

    # Labels: int32 [n_groups, B_pad, G] (no trailing size-1 dim).
    lbl_g = (labels.astype(jnp.int32)
             .reshape(n_groups, G, B)
             .transpose(0, 2, 1))
    if B_pad != B:
        lbl_g = jnp.pad(lbl_g, ((0, 0), (0, B_pad - B), (0, 0)))

    cost = pl.CostEstimate(
        flops=2 * B_pad * D * GCp * n_groups,
        transcendentals=B_pad * n_groups * GCp,
        bytes_accessed=(x.size * 4 + w_g.size * 2 + b_g.size * 4
                        + lbl_g.size * 4 + n_btiles * n_groups * G * 4),
    )

    partial_sums = pl.pallas_call(
        fpartial(multi_ce_kernel, num_classes=C, batch_size=B,
                 block_rows=block_rows),
        out_shape=jax.ShapeDtypeStruct((n_btiles, n_groups, 1, G), jnp.float32),
        grid_spec=pltpu.PrefetchScalarGridSpec(
            num_scalar_prefetch=0,
            grid=(n_btiles, n_groups),
            in_specs=[
                pl.BlockSpec((block_rows, D), lambda bt, g: (bt, 0)),       # x (f32)
                pl.BlockSpec((1, D, GCp), lambda bt, g: (g, 0, 0)),         # folded W
                pl.BlockSpec((1, 1, GCp), lambda bt, g: (g, 0, 0)),         # folded b
                pl.BlockSpec((1, block_rows, G), lambda bt, g: (g, bt, 0)), # labels
            ],
            out_specs=pl.BlockSpec((1, 1, 1, G), lambda bt, g: (bt, g, 0, 0)),
        ),
        compiler_params=pltpu.CompilerParams(
            dimension_semantics=("parallel", "parallel"),
        ),
        cost_estimate=cost,
    )(x, w_g, b_g, lbl_g)

    # Finish the batch mean + uncertainty weighting (tiny epilogue).
    losses = partial_sums.sum(axis=0).reshape(n_cond) / B               # [n_cond]
    wts = cond_weights.astype(jnp.float32)
    return jnp.sum(losses * jnp.exp(-wts) + wts)


def reference(images, labels, head_w, head_b, cond_weights):
    B = images.shape[0]
    x = images.reshape(B, -1).astype(jnp.float32)
    logits = jnp.einsum('bd,ndc->nbc', x, head_w) + head_b[:, None, :]
    logp = jax.nn.log_softmax(logits, axis=-1)
    nll = -jnp.take_along_axis(logp, labels[..., None], axis=-1)[..., 0]
    losses = nll.mean(axis=-1)                                          # [n_cond]
    return jnp.sum(losses * jnp.exp(-cond_weights) + cond_weights)


if __name__ == "__main__":
    key = jax.random.PRNGKey(0)
    k_img, k_w, k_b, k_lbl = jax.random.split(key, 4)

    B, C_img, H, W = 8, 4, 8, 8          # images NCHW
    n_conditions = 4
    num_classes = 16
    D = C_img * H * W                    # 256

    images = jax.random.normal(k_img, (B, C_img, H, W), dtype=jnp.float32)
    labels = jax.random.randint(k_lbl, (n_conditions, B), 0, num_classes,
                                dtype=jnp.int32)

    head_w = 0.05 * jax.random.normal(k_w, (n_conditions, D, num_classes),
                                      dtype=jnp.float32)
    head_b = 0.01 * jax.random.normal(k_b, (n_conditions, num_classes),
                                      dtype=jnp.float32)
    cond_weights = jnp.ones((n_conditions,), dtype=jnp.float32)

    # One-time fold (hoisted off the per-step path).
    w_g, b_g, meta = fold_heads(head_w, head_b)
    w_g, b_g = jax.block_until_ready((w_g, b_g))

    loss = multi_ce_weighted(images, labels, w_g, b_g, cond_weights, meta)
    loss = jax.block_until_ready(loss)

    ref = reference(images, labels, head_w, head_b, cond_weights)
    # bf16 x/weights (f32 accumulate) vs f32 reference -> loosened tolerance.
    assert jnp.allclose(loss, ref, rtol=2e-2, atol=2e-2), (loss, ref)

    print("KERNEL_OK")
</pallas_src>

<mosaic_0001>
module attributes {stable_mosaic.version = 11 : i64} {
  func.func @multi_ce_kernel(%arg0: i32, %arg1: i32, %arg2: memref<8x256xf32, #tpu.memory_space<vmem>>, %arg3: memref<1x256x128xbf16, #tpu.memory_space<vmem>>, %arg4: memref<1x1x128xf32, #tpu.memory_space<vmem>>, %arg5: memref<1x8x4xi32, #tpu.memory_space<vmem>>, %arg6: memref<1x1x1x4xf32, #tpu.memory_space<vmem>>) attributes {dimension_semantics = [#tpu.dimension_semantics<parallel>, #tpu.dimension_semantics<parallel>], iteration_bounds = array<i64: 1, 1>, scalar_prefetch = 0 : i64, scratch_operands = 0 : i64, tpu.core_type = #tpu.core_type<tc>, window_params = [{transform_indices = @transform_0, window_bounds = array<i64: 8, 256>}, {transform_indices = @transform_1, window_bounds = array<i64: 1, 256, 128>}, {transform_indices = @transform_2, window_bounds = array<i64: 1, 1, 128>}, {transform_indices = @transform_3, window_bounds = array<i64: 1, 8, 4>}, {transform_indices = @transform_4, window_bounds = array<i64: 1, 1, 1, 4>}]} {
    %c0 = arith.constant 0 : index
    %c0_0 = arith.constant 0 : index
    %0 = vector.load %arg2[%c0, %c0_0] : memref<8x256xf32, #tpu.memory_space<vmem>>, vector<8x256xf32>
    %1 = arith.truncf %0 : vector<8x256xf32> to vector<8x256xbf16>
    %c0_1 = arith.constant 0 : index
    %c0_2 = arith.constant 0 : index
    %c0_3 = arith.constant 0 : index
    %2 = vector.load %arg3[%c0_1, %c0_2, %c0_3] : memref<1x256x128xbf16, #tpu.memory_space<vmem>>, vector<1x256x128xbf16>
    %3 = vector.shape_cast %2 : vector<1x256x128xbf16> to vector<256x128xbf16>
    %c0_4 = arith.constant 0 : index
    %c0_5 = arith.constant 0 : index
    %c0_6 = arith.constant 0 : index
    %4 = vector.load %arg4[%c0_4, %c0_5, %c0_6] : memref<1x1x128xf32, #tpu.memory_space<vmem>>, vector<1x1x128xf32>
    %5 = vector.shape_cast %4 : vector<1x1x128xf32> to vector<1x128xf32>
    %c0_7 = arith.constant 0 : index
    %c0_8 = arith.constant 0 : index
    %c0_9 = arith.constant 0 : index
    %6 = vector.load %arg5[%c0_7, %c0_8, %c0_9] : memref<1x8x4xi32, #tpu.memory_space<vmem>>, vector<1x8x4xi32>
    %7 = vector.shape_cast %6 : vector<1x8x4xi32> to vector<8x4xi32>
    %cst = arith.constant dense<0.000000e+00> : vector<8x128xf32>
    %8 = tpu.matmul %1, %3, %cst {dimension_numbers = #tpu.dot_dimension_numbers<[1], [0], [0], [1], [0, 0, 1, 1], [], []>} : vector<8x256xbf16>, vector<256x128xbf16>, vector<8x128xf32> -> vector<8x128xf32>
    %9 = vector.broadcast %5 : vector<1x128xf32> to vector<8x128xf32>
    %10 = arith.addf %8, %9 : vector<8x128xf32>
    %11 = vector.shape_cast %10 : vector<8x128xf32> to vector<8x4x32xf32>
    %12 = tpu.iota {dimensions = array<i32: 2>} : vector<8x4x32xi32>
    %c16_i32 = arith.constant 16 : i32
    %13 = vector.broadcast %c16_i32 : i32 to vector<8x4x32xi32>
    %14 = arith.cmpi slt, %12, %13 : vector<8x4x32xi32>
    %cst_10 = arith.constant -1.000000e+30 : f32
    %15 = vector.broadcast %cst_10 : f32 to vector<8x4x32xf32>
    %16 = arith.select %14, %11, %15 : vector<8x4x32xi1>, vector<8x4x32xf32>
    %cst_11 = arith.constant dense<0xFF800000> : vector<8x4xf32>
    %17 = vector.multi_reduction <maximumf>, %16, %cst_11 [2] : vector<8x4x32xf32> to vector<8x4xf32>
    %18 = vector.shape_cast %17 : vector<8x4xf32> to vector<8x4x1xf32>
    %19 = vector.broadcast %18 : vector<8x4x1xf32> to vector<8x4x32xf32>
    %20 = arith.subf %16, %19 : vector<8x4x32xf32>
    %21 = math.exp %20 : vector<8x4x32xf32>
    %cst_12 = arith.constant dense<0.000000e+00> : vector<8x4xf32>
    %22 = vector.multi_reduction <add>, %21, %cst_12 [2] : vector<8x4x32xf32> to vector<8x4xf32>
    %23 = vector.shape_cast %22 : vector<8x4xf32> to vector<8x4x1xf32>
    %24 = math.log %23 : vector<8x4x1xf32>
    %25 = arith.addf %24, %18 : vector<8x4x1xf32>
    %26 = vector.shape_cast %7 : vector<8x4xi32> to vector<8x4x1xi32>
    %27 = vector.broadcast %26 : vector<8x4x1xi32> to vector<8x4x32xi32>
    %28 = arith.cmpi eq, %12, %27 : vector<8x4x32xi32>
    %cst_13 = arith.constant 0.000000e+00 : f32
    %29 = vector.broadcast %cst_13 : f32 to vector<8x4x32xf32>
    %30 = arith.select %28, %11, %29 : vector<8x4x32xi1>, vector<8x4x32xf32>
    %cst_14 = arith.constant dense<0.000000e+00> : vector<8x4xf32>
    %31 = vector.multi_reduction <add>, %30, %cst_14 [2] : vector<8x4x32xf32> to vector<8x4xf32>
    %32 = vector.shape_cast %31 : vector<8x4xf32> to vector<8x4x1xf32>
    %33 = arith.subf %25, %32 : vector<8x4x1xf32>
    %34 = vector.shape_cast %33 : vector<8x4x1xf32> to vector<8x4xf32>
    %35 = tpu.iota {dimensions = array<i32: 0>} : vector<8x4xi32>
    %c8_i32 = arith.constant 8 : i32
    %36 = arith.muli %arg0, %c8_i32 : i32
    %37 = vector.broadcast %36 : i32 to vector<8x4xi32>
    %38 = arith.addi %35, %37 : vector<8x4xi32>
    %c8_i32_15 = arith.constant 8 : i32
    %39 = vector.broadcast %c8_i32_15 : i32 to vector<8x4xi32>
    %40 = arith.cmpi slt, %38, %39 : vector<8x4xi32>
    %cst_16 = arith.constant 0.000000e+00 : f32
    %41 = vector.broadcast %cst_16 : f32 to vector<8x4xf32>
    %42 = arith.select %40, %34, %41 : vector<8x4xi1>, vector<8x4xf32>
    %cst_17 = arith.constant dense<0.000000e+00> : vector<4xf32>
    %43 = vector.multi_reduction <add>, %42, %cst_17 [0] : vector<8x4xf32> to vector<4xf32>
    %44 = vector.shape_cast %43 : vector<4xf32> to vector<1x4xf32>
    %c0_18 = arith.constant 0 : index
    %c0_19 = arith.constant 0 : index
    %c0_20 = arith.constant 0 : index
    %c0_21 = arith.constant 0 : index
    %45 = vector.load %arg6[%c0_18, %c0_19, %c0_20, %c0_21] : memref<1x1x1x4xf32, #tpu.memory_space<vmem>>, vector<1x1x1x4xf32>
    %46 = vector.shape_cast %45 : vector<1x1x1x4xf32> to vector<1x4xf32>
    %47 = vector.shape_cast %44 : vector<1x4xf32> to vector<1x1x1x4xf32>
    tpu.vector_store %arg6[%c0_18, %c0_19, %c0_20, %c0_21], %47 {strides = array<i32>} : memref<1x1x1x4xf32, #tpu.memory_space<vmem>>, vector<1x1x1x4xf32>,
    return
  }
  func.func @transform_0(%arg0: i32, %arg1: i32) -> (i32, i32) {
    %c0_i32 = arith.constant 0 : i32
    %c0_i32_0 = arith.constant 0 : i32
    return %arg0, %c0_i32 : i32, i32
  }
  func.func @transform_1(%arg0: i32, %arg1: i32) -> (i32, i32, i32) {
    %c0_i32 = arith.constant 0 : i32
    %c0_i32_0 = arith.constant 0 : i32
    %c0_i32_1 = arith.constant 0 : i32
    return %arg1, %c0_i32, %c0_i32_0 : i32, i32, i32
  }
  func.func @transform_2(%arg0: i32, %arg1: i32) -> (i32, i32, i32) {
    %c0_i32 = arith.constant 0 : i32
    %c0_i32_0 = arith.constant 0 : i32
    %c0_i32_1 = arith.constant 0 : i32
    return %arg1, %c0_i32, %c0_i32_0 : i32, i32, i32
  }
  func.func @transform_3(%arg0: i32, %arg1: i32) -> (i32, i32, i32) {
    %c0_i32 = arith.constant 0 : i32
    %c0_i32_0 = arith.constant 0 : i32
    return %arg1, %arg0, %c0_i32 : i32, i32, i32
  }
  func.func @transform_4(%arg0: i32, %arg1: i32) -> (i32, i32, i32, i32) {
    %c0_i32 = arith.constant 0 : i32
    %c0_i32_0 = arith.constant 0 : i32
    %c0_i32_1 = arith.constant 0 : i32
    return %arg0, %arg1, %c0_i32, %c0_i32_0 : i32, i32, i32, i32
  }
}

</mosaic_0001>

<bundles_post_ra>
// kernel: tpu_custom_call.1
= control target key start
LH: loop header
LB: loop body
LE: loop exit
PB: predicated region body
PF: predicated region fallthrough
CT: control target
= control target key end

     0   :  { %9 = vsyncpa [#allocation3], 0  ;;  %s1004_s0 = inlined_call_operand.hbm [shape: f32[8,256], index: 0, kind: input, shape index: {}]   ;;  %s1005_s1 = inlined_call_operand.hbm [shape: bf16[1,256,128], index: 1, kind: input, shape index: {}]   ;;  %s1006_s2 = inlined_call_operand.vmem [shape: f32[1,1,128], index: 2, kind: input, shape index: {}]   ;;  %s1007_s3 = inlined_call_operand.vmem [shape: s32[1,8,4], index: 3, kind: input, shape index: {}]   ;;  %s1008_s4 = inlined_call_operand.hbm [shape: f32[1,1,1,4], index: 4, kind: output, shape index: {}]  }
   0x1   :  { %10 = vsyncpa [#allocation6], 0 }
   0x2   :  { %11 = vsyncpa [#allocation4], 0  ;;  %s772_s15 = smov [#allocation2]   ;;  %s773_s17 = smov [#allocation5]  }
   0x3   :  { %s18_s16 = sshll.u32 %s772_s15, 4  ;;  %s27_s18 = sshll.u32 %s773_s17, 4  ;;  %s19_s16 = int_to_ptr.vmem [resolvable:$true] %s18_s16  ;;  %s807_s18 = int_to_ptr.vmem [resolvable:$true] %s27_s18 }
   0x4   :  { %s700_s21 = scalar_lea.hbm %s1004_s0, 256 }
   0x5   :  { %p701_p0 = scmp.ne.s32.totalorder %s1004_s0, %s700_s21  ;;  %p704_p1 = scmp.lt.u32.totalorder %s700_s21, %s1004_s0 }
   0x7   :  { %p706_p2 = pnand %p704_p1, %p701_p0 }
   0x9   :  { %709 = shalt.err (!%p706_p2)
}
   0xa   :  { %s710_s26 = scalar_lea.vmem %s19_s16, 256  ;;  %p715_p4 = scmp.lt.s32.totalorder %s19_s16, %s19_s16 }
   0xb   :  { %p711_p3 = scmp.ne.s32.totalorder %s19_s16, %s710_s26  ;;  %p716_p5 = scmp.lt.s32.totalorder %s710_s26, %s710_s26 }
   0xd   :  { %p717_p6 = por %p716_p5, %p715_p4 }
   0xf   :  { %p718_p7 = pnand %p717_p6, %p711_p3 }
  0x11   :  { %721 = shalt.err (!%p718_p7)
}
  0x12   :  { %21 = dma.hbm_to_vmem [thread:$0]  %s1004_s0, 256, %s19_s16, [#allocation3]  }
  0x13   :  { %s722_s5 = scalar_lea.hbm %s1005_s1, 2048 }
  0x14   :  { %p723_p8 = scmp.ne.s32.totalorder %s1005_s1, %s722_s5  ;;  %p726_p9 = scmp.lt.u32.totalorder %s722_s5, %s1005_s1 }
  0x16   :  { %p728_p10 = pnand %p726_p9, %p723_p8 }
  0x18   :  { %731 = shalt.err (!%p728_p10)
}
  0x19   :  { %s732_s10 = scalar_lea.vmem %s807_s18, 2048  ;;  %p737_p12 = scmp.lt.s32.totalorder %s807_s18, %s807_s18 }
  0x1a   :  { %p733_p11 = scmp.ne.s32.totalorder %s807_s18, %s732_s10  ;;  %p738_p13 = scmp.lt.s32.totalorder %s732_s10, %s732_s10 }
  0x1c   :  { %p739_p0 = por %p738_p13, %p737_p12 }
  0x1e   :  { %p740_p1 = pnand %p739_p0, %p733_p11 }
  0x20   :  { %743 = shalt.err (!%p740_p1)
}
  0x21   :  { %s774_s0 = smov 64   ;;  %s775_s11 = smov 4  }
  0x22   :  { %33 = dma.hbm_to_vmem [thread:$0]  %s1005_s1, 2048, %s807_s18, [#allocation6], %s774_s0, %s774_s0, %s775_s11  }
  0x23   :  { %766 = dma.done.wait [#allocation3], 256  }
  0x24   :  { %767 = vsyncadd [#allocation3], 4294967040 }
  0x25   :  { %768 = dma.done.wait [#allocation6], 2048  }
  0x26   :  { %769 = vsyncadd [#allocation6], 4294965248  ;;  %v652_v0 = vld [vmem:[#allocation5 + $0x40] sm:$0xff]   ;;  %v654_v2 = vld [vmem:[#allocation5 + $0x48] sm:$0xff]   ;;  %s776_s15 = smov 32   ;;  %s777_s16 = smov 96   ;;  %v240_v29 = vlaneseq }
  0x27   :  { %v653_v1 = vld [vmem:[#allocation5] sm:$0xff]   ;;  %620 = vmatprep.subr.bf16.mxu0 %v652_v0  ;;  %v655_v3 = vld [vmem:[#allocation5 + $0x8] sm:$0xff]   ;;  %v656_v4 = vld [vmem:[#allocation5 + $0x50] sm:$0xff]   ;;  %v778_v27 = vmov 1983009808   ;;  %vm314_vm1 = vcmask 257024  }
  0x28   :  { %621 = vmatpush3.bf16.msra.mxu0 %v653_v1  ;;  %v657_v5 = vld [vmem:[#allocation5 + $0x10] sm:$0xff]   ;;  %v658_v6 = vld [vmem:[#allocation5 + $0x58] sm:$0xff]   ;;  %v660_v8 = vld [vmem:[#allocation5 + $0x60] sm:$0xff]   ;;  %v238_v28 = vunpack.c.l.s4 %v778_v27  ;;  %v844_v31 = vshrl.u32 %v240_v29, 7  ;;  %v779_v32 = vmov 1934713408  }
  0x29   :  { %622 = vmatprep.subr.bf16.mxu0 %v654_v2  ;;  %v659_v7 = vld [vmem:[#allocation5 + $0x18] sm:$0xff]   ;;  %v661_v9 = vld [vmem:[#allocation5 + $0x20] sm:$0xff]   ;;  %v662_v10 = vld [vmem:[#allocation5 + $0x68] sm:$0xff]   ;;  %v270_v33 = vunpack.c.l.s4 %v779_v32  ;;  %v847_v43 = vand.u32 127, %v240_v29  ;;  %v780_v56 = vmov 0.0   ;;  %vm561_vm10 = vcmask 1041409  }
  0x2a   :  { %v46_v11 = vld [vmem:[#allocation2 + $0x8] sm:$0xff]  ;;  %v663_v13 = vld [vmem:[#allocation5 + $0x28] sm:$0xff]   ;;  %v664_v14 = vld [vmem:[#allocation5 + $0x70] sm:$0xff]   ;;  %v239_v30 = vunpack.c.0.s8 %v238_v28  ;;  %v441_v27 = vsub.s32 4, %v844_v31  ;;  %v455_v29 = vsub.s32 6, %v844_v31  ;;  %vm563_vm11 = vcmask 1042434  }
  0x2b   :  { %v48_v12 = vpack.c.bf16 %v46_v11, %v46_v11  ;;  %v665_v15 = vld [vmem:[#allocation5 + $0x30] sm:$0xff]   ;;  %v666_v16 = vld [vmem:[#allocation5 + $0x78] sm:$0xff]   ;;  %v271_v38 = vunpack.c.0.s8 %v270_v33  ;;  %vm305_vm0 = vcmp.lt.s32.totalorder %v847_v43, 16  ;;  %vm565_vm12 = vcmask 1043459  }
  0x2c   :  { %623 = vmatpush3.bf16.msra.mxu0 %v655_v3  ;;  %v667_v17 = vld [vmem:[#allocation5 + $0x38] sm:$0xff]   ;;  %v45_v18 = vld [vmem:[#allocation2] sm:$0xff]  ;;  %v242_v36 = vsub.s32 %v239_v30, %v844_v31  ;;  %vm567_vm13 = vcmask 1044484   ;;  %vm569_vm14 = vcmask 1045509   ;;  %vm571_vm15 = vcmask 1046534  }
  0x2d   :  { %624 = vmatprep.subr.bf16.mxu0 %v656_v4  ;;  %217 = vmatprep.mubr.bf16.mxu0 %v48_v12  ;;  %v47_v19 = vpack.c.bf16 %v45_v18, %v45_v18  ;;  %v603_v21 = vld [vmem:[%s1006_s2] ss:$0 sm:$0xff]  ;;  %v274_v47 = vsub.s32 %v271_v38, %v844_v31  ;;  %v420_v4 = vsub.s32 1, %v844_v31  ;;  %v448_v12 = vsub.s32 5, %v844_v31 }
  0x30   :  { %625 = vmatpush3.bf16.msra.mxu0 %v657_v5  ;;  %v82_v5 = vld [vmem:[%s1007_s3] sm:$0xff]  ;;  %s781_s3 = smov [#allocation7]  }
  0x31   :  { %626 = vmatprep.subr.bf16.mxu0 %v658_v6  ;;  %v442_v28 = vrot.slane %v82_v5, %v441_v27  ;;  %v456_v30 = vrot.slane %v82_v5, %v455_v29  ;;  %s593_s18 = sshll.u32 %s781_s3, 4  ;;  %s594_s18 = int_to_ptr.vmem [resolvable:$true] %s593_s18 }
  0x32   :  { %s744_s19 = scalar_lea.vmem %s594_s18, 16  ;;  %s748_s20 = scalar_lea.vmem %s594_s18, 32 }
  0x33   :  { %p745_p2 = scmp.ne.s32.totalorder %s594_s18, %s744_s19  ;;  %p749_p3 = scmp.lt.s32.totalorder %s594_s18, %s594_s18 }
  0x34   :  { %627 = vmatpush3.bf16.msra.mxu0 %v659_v7  ;;  %v421_v7 = vrot.slane %v82_v5, %v420_v4  ;;  %p750_p4 = scmp.lt.s32.totalorder %s748_s20, %s744_s19 }
  0x35   :  { %628 = vmatprep.subr.bf16.mxu0 %v660_v8  ;;  %v413_v8 = vsub.s32 0, %v844_v31 }
  0x36   :  { %p751_p5 = por %p750_p4, %p749_p3 }
  0x38   :  { %629 = vmatpush3.bf16.msra.mxu0 %v661_v9  ;;  %v414_v9 = vrot.slane %v82_v5, %v413_v8  ;;  %p752_p6 = pnand %p751_p5, %p745_p2 }
  0x39   :  { %630 = vmatprep.subr.bf16.mxu0 %v662_v10  ;;  %v434_v10 = vsub.s32 3, %v844_v31 }
  0x3b   :  { %v435_v11 = vrot.slane %v82_v5, %v434_v10 }
  0x3c   :  { %631 = vmatpush3.bf16.msra.mxu0 %v663_v13  ;;  %v449_v13 = vrot.slane %v82_v5, %v448_v12 }
  0x3d   :  { %632 = vmatprep.subr.bf16.mxu0 %v664_v14  ;;  %v462_v14 = vsub.s32 7, %v844_v31 }
  0x40   :  { %633 = vmatpush3.bf16.msra.mxu0 %v665_v15  ;;  %v463_v15 = vrot.slane %v82_v5, %v462_v14 }
  0x41   :  { %634 = vmatprep.subr.bf16.mxu0 %v666_v16 }
  0x44   :  { %635 = vmatpush3.bf16.msra.mxu0 %v667_v17 }
  0x47   :  { %218 = vmatmul.mubr.bf16.vlgmr.msra.gmra.mrb[0].mxu0 %v47_v19 }
 0x11a   :  { %v636_v20 = vpop.f32.mrb[0].mxu0 }
 0x11b   :  { %v637_v22 = vpop.f32.mrb[1].mxu0 }
 0x11c   :  { %v638_v23 = vadd.f32 %v637_v22, %v636_v20  ;;  %v639_v24 = vpop.f32.mrb[2].mxu0 }
 0x11d   :  { %v640_v25 = vpop.f32.mrb[3].mxu0 }
 0x11e   :  { %v220_v26 = vadd.f32 %v638_v23, %v603_v21  ;;  %v427_v25 = vsub.s32 2, %v844_v31 }
 0x120   :  { %232 = vrot.lane.b32.xlu1 %v220_v26, %s776_s15  ;;  %226 = vrot.lane.b32.xlu0 %v220_v26, %s777_s16 }
 0x124   :  { %229 = vrot.lane.b32.xlu0 %v220_v26, %s774_s0 }
 0x192   :  { %v233_v34 = vpop.permute.xlu1 %232  ;;  %v227_v35 = vpop.permute.xlu0 %226 }
 0x193   :  { %v251_v37 = vcombine.low %v227_v35, %v233_v34  ;;  %v252_v40 = vcombine.high %v227_v35, %v233_v34 }
 0x195   :  { %v259_v44 = vrot.slane %v251_v37, %v242_v36  ;;  %v266_v48 = vrot.slane %v252_v40, %v242_v36 }
 0x196   :  { %v230_v39 = vpop.permute.xlu0 %229 }
 0x197   :  { %v235_v41 = vcombine.low %v220_v26, %v230_v39  ;;  %v236_v42 = vcombine.high %v220_v26, %v230_v39  ;;  %v428_v26 = vrot.slane %v82_v5, %v427_v25 }
 0x199   :  { %v243_v45 = vrot.slane %v235_v41, %v242_v36  ;;  %v250_v46 = vrot.slane %v236_v42, %v242_v36 }
 0x19b   :  { %v267_v49 = vcombine.low %v243_v45, %v259_v44  ;;  %v268_v50 = vcombine.high %v243_v45, %v259_v44  ;;  %v283_v51 = vcombine.low %v250_v46, %v266_v48  ;;  %v284_v60 = vcombine.high %v250_v46, %v266_v48 }
 0x19d   :  { %v851_v52 = vrot.slane %v268_v50, %v274_v47  ;;  %v853_v53 = vrot.slane %v267_v49, %v274_v47  ;;  %v869_v62 = vrot.slane %v283_v51, %v274_v47  ;;  %v875_v1 = vrot.slane %v284_v60, %v274_v47 }
 0x19f   :  { %v308_v54 = vsel %vm305_vm0, %v851_v52, -1e+30  ;;  %v306_v55 = vsel %vm305_vm0, %v853_v53, -1e+30  ;;  %v862_v57 = vcombine.high %v853_v53, %v780_v56  ;;  %v310_v0 = vsel %vm305_vm0, %v869_v62, -1e+30 }
 0x1a0   :  { %v321_v58 = vsel %vm314_vm1, %v308_v54, -inf  ;;  %v315_v59 = vsel %vm314_vm1, %v306_v55, -inf  ;;  %v327_v2 = vsel %vm314_vm1, %v310_v0, -inf  ;;  %v312_v3 = vsel %vm305_vm0, %v875_v1, -1e+30 }
 0x1a1   :  { %322 = vmax.xlane.f32.xlu0 %v321_v58  ;;  %316 = vmax.xlane.f32.xlu1 %v315_v59  ;;  %v307_v61 = vsel %vm305_vm0, %v862_v57, -1e+30  ;;  %v333_v6 = vsel %vm314_vm1, %v312_v3, -inf  ;;  %v891_v16 = vcombine.high %v851_v52, %v780_v56  ;;  %v899_v18 = vcombine.high %v869_v62, %v780_v56 }
 0x1a2   :  { %v318_v63 = vsel %vm314_vm1, %v307_v61, -inf  ;;  %v909_v21 = vcombine.high %v875_v1, %v780_v56 }
 0x1a3   :  { %v896_v17 = vsel %vm305_vm0, %v891_v16, -1e+30  ;;  %v906_v20 = vsel %vm305_vm0, %v899_v18, -1e+30 }
 0x1a4   :  { %v324_v19 = vsel %vm314_vm1, %v896_v17, -inf  ;;  %v330_v22 = vsel %vm314_vm1, %v906_v20, -inf  ;;  %v916_v23 = vsel %vm305_vm0, %v909_v21, -1e+30  ;;  %vm573_vm0 = vcmask 1047559  }
 0x1a5   :  { %319 = vmax.xlane.f32.xlu0 %v318_v63  ;;  %v336_v24 = vsel %vm314_vm1, %v916_v23, -inf }
 0x1a9   :  { %328 = vmax.xlane.f32.xlu0 %v327_v2 }
 0x1ad   :  { %334 = vmax.xlane.f32.xlu0 %v333_v6 }
 0x1b2   :  { %423 = vbcast.lane.b32.xlu1 %v421_v7, 256 }
 0x1c3   :  { %416 = vbcast.lane.b32.xlu0 %v414_v9, 256 }
 0x1c7   :  { %437 = vbcast.lane.b32.xlu0 %v435_v11, 256 }
 0x1cb   :  { %451 = vbcast.lane.b32.xlu0 %v449_v13, 256 }
 0x1cf   :  { %465 = vbcast.lane.b32.xlu0 %v463_v15, 256 }
 0x1d6   :  { %325 = vmax.xlane.f32.xlu1 %v324_v19 }
 0x1da   :  { %331 = vmax.xlane.f32.xlu1 %v330_v22 }
 0x1de   :  { %337 = vmax.xlane.f32.xlu1 %v336_v24 }
 0x1ef   :  { %430 = vbcast.lane.b32.xlu1 %v428_v26, 256 }
 0x1f3   :  { %444 = vbcast.lane.b32.xlu1 %v442_v28, 256 }
 0x1f7   :  { %458 = vbcast.lane.b32.xlu1 %v456_v30, 256 }
 0x22e   :  { %v923_v32 = vpop.xlane.xlu0 %322  ;;  %v925_v33 = vpop.xlane.xlu1 %316 }
 0x22f   :  { %v341_v34 = vsub.f32 %v308_v54, %v923_v32  ;;  %v339_v35 = vsub.f32 %v306_v55, %v925_v33 }
 0x231   :  { %v351_v36 = vmul.f32 1.442695, %v341_v34  ;;  %v347_v37 = vmul.f32 1.442695, %v339_v35 }
 0x232   :  { %v929_v38 = vpop.xlane.xlu0 %319  ;;  %v424_v2 = vpop.permute.xlu1 %423 }
 0x233   :  { %668 = vpow2.f32 %v351_v36  ;;  %v340_v39 = vsub.f32 %v307_v61, %v929_v38  ;;  %vm468_vm6 = vcmp.eq.s32.totalorder %v847_v43, %v424_v2 }
 0x234   :  { %670 = vpow2.f32 %v347_v37  ;;  %v476_v29 = vsel %vm468_vm6, %v862_v57, 0.0 }
 0x235   :  { %v349_v42 = vmul.f32 1.442695, %v340_v39  ;;  %v486_v30 = vsel %vm314_vm1, %v476_v29, 0.0 }
 0x236   :  { %v932_v40 = vpop.xlane.xlu0 %328 }
 0x237   :  { %v343_v41 = vsub.f32 %v310_v0, %v932_v40 }
 0x239   :  { %v355_v44 = vmul.f32 1.442695, %v343_v41 }
 0x23a   :  { %v935_v45 = vpop.xlane.xlu0 %334 }
 0x23b   :  { %672 = vpow2.f32 %v355_v44  ;;  %v345_v46 = vsub.f32 %v312_v3, %v935_v45 }
 0x23c   :  { %674 = vpow2.f32 %v349_v42 }
 0x23d   :  { %v669_v47 = vpop.eup %668  ;;  %v359_v48 = vmul.f32 1.442695, %v345_v46 }
 0x23e   :  { %v671_v49 = vpop.eup %670  ;;  %v369_v50 = vsel %vm314_vm1, %v669_v47, 0.0  ;;  %v417_v58 = vpop.permute.xlu0 %416 }
 0x23f   :  { %v363_v51 = vsel %vm314_vm1, %v671_v49, 0.0  ;;  %370 = vadd.xlane.f32.xlu0 %v369_v50  ;;  %676 = vpow2.f32 %v359_v48  ;;  %vm467_vm2 = vcmp.eq.s32.totalorder %v847_v43, %v417_v58 }
 0x240   :  { %364 = vadd.xlane.f32.xlu1 %v363_v51  ;;  %v475_v63 = vsel %vm467_vm2, %v853_v53, 0.0  ;;  %vm585_vm2 = vcmask 24576  }
 0x241   :  { %v483_v0 = vsel %vm314_vm1, %v475_v63, 0.0  ;;  %v531_v63 = vsub.s32 %v847_v43, %v844_v31 }
 0x242   :  { %v438_v22 = vpop.permute.xlu0 %437 }
 0x243   :  { %vm470_vm7 = vcmp.eq.s32.totalorder %v847_v43, %v438_v22 }
 0x244   :  { %v478_v34 = vsel %vm470_vm7, %v891_v16, 0.0 }
 0x245   :  { %v673_v54 = vpop.eup %672  ;;  %v492_v35 = vsel %vm314_vm1, %v478_v34, 0.0 }
 0x246   :  { %v375_v55 = vsel %vm314_vm1, %v673_v54, 0.0  ;;  %v675_v56 = vpop.eup %674  ;;  %v452_v28 = vpop.permute.xlu0 %451 }
 0x247   :  { %376 = vadd.xlane.f32.xlu0 %v375_v55  ;;  %v366_v59 = vsel %vm314_vm1, %v675_v56, 0.0  ;;  %vm472_vm8 = vcmp.eq.s32.totalorder %v847_v43, %v452_v28 }
 0x248   :  { %v480_v36 = vsel %vm472_vm8, %v899_v18, 0.0 }
 0x249   :  { %v677_v60 = vpop.eup %676  ;;  %v498_v37 = vsel %vm314_vm1, %v480_v36, 0.0 }
 0x24a   :  { %v381_v61 = vsel %vm314_vm1, %v677_v60, 0.0 }
 0x24b   :  { %367 = vadd.xlane.f32.xlu0 %v366_v59 }
 0x24f   :  { %382 = vadd.xlane.f32.xlu0 %v381_v61 }
 0x253   :  { %484 = vadd.xlane.f32.xlu0 %v483_v0 }
 0x263   :  { %v946_v3 = vpop.xlane.xlu1 %325 }
 0x264   :  { %v342_v4 = vsub.f32 %v896_v17, %v946_v3 }
 0x266   :  { %v353_v5 = vmul.f32 1.442695, %v342_v4 }
 0x267   :  { %v950_v6 = vpop.xlane.xlu1 %331 }
 0x268   :  { %678 = vpow2.f32 %v353_v5  ;;  %v344_v7 = vsub.f32 %v906_v20, %v950_v6 }
 0x26a   :  { %v357_v8 = vmul.f32 1.442695, %v344_v7 }
 0x26b   :  { %v954_v9 = vpop.xlane.xlu1 %337 }
 0x26c   :  { %680 = vpow2.f32 %v357_v8  ;;  %v346_v53 = vsub.f32 %v916_v23, %v954_v9 }
 0x26e   :  { %v361_v10 = vmul.f32 1.442695, %v346_v53 }
 0x26f   :  { %v431_v11 = vpop.permute.xlu1 %430 }
 0x270   :  { %682 = vpow2.f32 %v361_v10  ;;  %vm469_vm3 = vcmp.eq.s32.totalorder %v847_v43, %v431_v11 }
 0x271   :  { %v477_v12 = vsel %vm469_vm3, %v851_v52, 0.0 }
 0x272   :  { %v679_v13 = vpop.eup %678  ;;  %v489_v14 = vsel %vm314_vm1, %v477_v12, 0.0 }
 0x273   :  { %v445_v15 = vpop.permute.xlu1 %444  ;;  %490 = vadd.xlane.f32.xlu0 %v489_v14  ;;  %v372_v17 = vsel %vm314_vm1, %v679_v13, 0.0 }
 0x274   :  { %vm471_vm4 = vcmp.eq.s32.totalorder %v847_v43, %v445_v15  ;;  %373 = vadd.xlane.f32.xlu1 %v372_v17 }
 0x275   :  { %v479_v19 = vsel %vm471_vm4, %v869_v62, 0.0 }
 0x276   :  { %v681_v20 = vpop.eup %680  ;;  %v495_v23 = vsel %vm314_vm1, %v479_v19, 0.0 }
 0x277   :  { %v459_v24 = vpop.permute.xlu1 %458  ;;  %496 = vadd.xlane.f32.xlu0 %v495_v23  ;;  %v378_v52 = vsel %vm314_vm1, %v681_v20, 0.0 }
 0x278   :  { %vm473_vm5 = vcmp.eq.s32.totalorder %v847_v43, %v459_v24  ;;  %379 = vadd.xlane.f32.xlu1 %v378_v52 }
 0x279   :  { %v481_v25 = vsel %vm473_vm5, %v875_v1, 0.0  ;;  %v466_v1 = vpop.permute.xlu0 %465 }
 0x27a   :  { %v683_v26 = vpop.eup %682  ;;  %v501_v27 = vsel %vm314_vm1, %v481_v25, 0.0  ;;  %vm474_vm9 = vcmp.eq.s32.totalorder %v847_v43, %v466_v1 }
 0x27b   :  { %502 = vadd.xlane.f32.xlu0 %v501_v27  ;;  %v384_v62 = vsel %vm314_vm1, %v683_v26, 0.0  ;;  %v482_v57 = vsel %vm474_vm9, %v909_v21, 0.0 }
 0x27c   :  { %385 = vadd.xlane.f32.xlu1 %v384_v62  ;;  %v504_v39 = vsel %vm314_vm1, %v482_v57, 0.0  ;;  %vm577_vm1 = vcmask 31744  }
 0x280   :  { %487 = vadd.xlane.f32.xlu1 %v486_v30 }
 0x284   :  { %493 = vadd.xlane.f32.xlu1 %v492_v35 }
 0x288   :  { %499 = vadd.xlane.f32.xlu1 %v498_v37 }
 0x28c   :  { %505 = vadd.xlane.f32.xlu1 %v504_v39 }
 0x2cc   :  { %v371_v41 = vpop.xlane.xlu0 %370 }
 0x2cd   :  { %v365_v42 = vpop.xlane.xlu1 %364 }
 0x2ce   :  { %684 = vlog2.f32 %v365_v42 }
 0x2d4   :  { %v377_v16 = vpop.xlane.xlu0 %376 }
 0x2d8   :  { %v368_v44 = vpop.xlane.xlu0 %367  ;;  %v685_v47 = vpop.eup %684 }
 0x2d9   :  { %686 = vlog2.f32 %v368_v44  ;;  %v388_v51 = vmul.f32 0.6931472, %v685_v47 }
 0x2da   :  { %688 = vlog2.f32 %v371_v41 }
 0x2db   :  { %690 = vlog2.f32 %v377_v16  ;;  %v403_v60 = vadd.f32 %v388_v51, %v925_v33 }
 0x2dc   :  { %v383_v46 = vpop.xlane.xlu0 %382 }
 0x2e0   :  { %v485_v48 = vpop.xlane.xlu0 %484 }
 0x2e1   :  { %v507_v0 = vsub.f32 %v403_v60, %v485_v48 }
 0x2e3   :  { %v687_v49 = vpop.eup %686  ;;  %v532_v14 = vrot.slane %v507_v0, %v531_v63 }
 0x2e4   :  { %v689_v21 = vpop.eup %688  ;;  %v390_v54 = vmul.f32 0.6931472, %v687_v49 }
 0x2e5   :  { %v392_v56 = vmul.f32 0.6931472, %v689_v21  ;;  %v691_v59 = vpop.eup %690 }
 0x2e6   :  { %v404_v2 = vadd.f32 %v390_v54, %v929_v38  ;;  %v396_v4 = vmul.f32 0.6931472, %v691_v59 }
 0x2e7   :  { %v405_v5 = vadd.f32 %v392_v56, %v923_v32 }
 0x2e8   :  { %v407_v31 = vadd.f32 %v396_v4, %v932_v40 }
 0x300   :  { %v491_v55 = vpop.xlane.xlu0 %490 }
 0x301   :  { %v374_v18 = vpop.xlane.xlu1 %373  ;;  %v509_v12 = vsub.f32 %v405_v5, %v491_v55 }
 0x302   :  { %692 = vlog2.f32 %v374_v18 }
 0x303   :  { %694 = vlog2.f32 %v383_v46  ;;  %v540_v20 = vrot.slane %v509_v12, %v531_v63 }
 0x304   :  { %v497_v10 = vpop.xlane.xlu0 %496 }
 0x305   :  { %v380_v50 = vpop.xlane.xlu1 %379  ;;  %v511_v22 = vsub.f32 %v407_v31, %v497_v10 }
 0x306   :  { %696 = vlog2.f32 %v380_v50 }
 0x307   :  { %v548_v29 = vrot.slane %v511_v22, %v531_v63 }
 0x308   :  { %v503_v52 = vpop.xlane.xlu0 %502 }
 0x309   :  { %v386_v58 = vpop.xlane.xlu1 %385 }
 0x30a   :  { %698 = vlog2.f32 %v386_v58 }
 0x30c   :  { %v693_v61 = vpop.eup %692 }
 0x30d   :  { %v394_v7 = vmul.f32 0.6931472, %v693_v61  ;;  %v488_v8 = vpop.xlane.xlu1 %487  ;;  %v695_v53 = vpop.eup %694 }
 0x30e   :  { %v508_v11 = vsub.f32 %v404_v2, %v488_v8  ;;  %v400_v17 = vmul.f32 0.6931472, %v695_v53 }
 0x30f   :  { %v406_v33 = vadd.f32 %v394_v7, %v946_v3 }
 0x310   :  { %v697_v13 = vpop.eup %696  ;;  %v536_v15 = vrot.slane %v508_v11, %v531_v63  ;;  %v409_v3 = vadd.f32 %v400_v17, %v935_v45 }
 0x311   :  { %v398_v43 = vmul.f32 0.6931472, %v697_v13  ;;  %v494_v38 = vpop.xlane.xlu1 %493 }
 0x312   :  { %v562_v19 = vsel %vm561_vm10, %v536_v15, %v532_v14  ;;  %v510_v32 = vsub.f32 %v406_v33, %v494_v38  ;;  %v513_v30 = vsub.f32 %v409_v3, %v503_v52 }
 0x313   :  { %v408_v23 = vadd.f32 %v398_v43, %v950_v6  ;;  %v564_v27 = vsel %vm563_vm11, %v540_v20, %v562_v19 }
 0x314   :  { %v699_v24 = vpop.eup %698  ;;  %v544_v25 = vrot.slane %v510_v32, %v531_v63  ;;  %v556_v57 = vrot.slane %v513_v30, %v531_v63 }
 0x315   :  { %v402_v26 = vmul.f32 0.6931472, %v699_v24  ;;  %v500_v62 = vpop.xlane.xlu1 %499 }
 0x316   :  { %v566_v28 = vsel %vm565_vm12, %v544_v25, %v564_v27  ;;  %v512_v40 = vsub.f32 %v408_v23, %v500_v62 }
 0x317   :  { %v410_v34 = vadd.f32 %v402_v26, %v954_v9  ;;  %v568_v35 = vsel %vm567_vm13, %v548_v29, %v566_v28 }
 0x318   :  { %v552_v1 = vrot.slane %v512_v40, %v531_v63 }
 0x319   :  { %v506_v36 = vpop.xlane.xlu1 %505 }
 0x31a   :  { %v570_v6 = vsel %vm569_vm14, %v552_v1, %v568_v35  ;;  %v514_v37 = vsub.f32 %v410_v34, %v506_v36 }
 0x31b   :  { %v572_v39 = vsel %vm571_vm15, %v556_v57, %v570_v6 }
 0x31c   :  { %v560_v45 = vrot.slane %v514_v37, %v531_v63 }
 0x31e   :  { %v574_v41 = vsel %vm573_vm0, %v560_v45, %v572_v39 }
 0x31f   :  { %v578_v16 = vsel %vm577_vm1, %v574_v41, 0.0 }
 0x320   :  { %v579_v42 = vrot.slane %v578_v16, 4 }
 0x322   :  { %v580_v44 = vadd.f32 %v579_v42, %v578_v16 }
 0x324   :  { %v581_v46 = vrot.slane %v580_v44, 2 }
 0x326   :  { %v582_v18 = vadd.f32 %v581_v46, %v580_v44 }
 0x328   :  { %v583_v9 = vrot.slane %v582_v18, 1 }
 0x32a   :  { %v584_v47 = vadd.f32 %v583_v9, %v582_v18 }
 0x32c   :  { %586 = vst.msk [vmem:[#allocation7] sm:$0x1] %vm585_vm2, %v584_v47 }
 0x32d   :  { %755 = shalt.err (!%p752_p6)
}
 0x32e   :  { %s756_s23 = scalar_lea.hbm %s1008_s4, 16 }
 0x32f   :  { %p757_p7 = scmp.ne.s32.totalorder %s1008_s4, %s756_s23  ;;  %p760_p8 = scmp.lt.u32.totalorder %s756_s23, %s1008_s4 }
 0x331   :  { %p762_p9 = pnand %p760_p8, %p757_p7 }
 0x333   :  { %765 = shalt.err (!%p762_p9)
}
 0x334   :  { %596 = dma.vmem_to_hbm [thread:$0]  %s594_s18, 16, %s1008_s4, [#allocation4]  }
 0x335   :  { %770 = dma.done.wait [#allocation4], 16  }
 0x336   :  { %771 = vsyncadd [#allocation4], 4294967280 }
 0x337   :  { %600 = vsyncpa [#allocation3], 1 }
 0x338   :  { %601 = vsyncpa [#allocation6], 1 }
 0x339   :  { %602 = vsyncpa [#allocation4], 1 }

</bundles_post_ra>
